<compile_context>
chip_gen: v6e
topology: v6e:2x2x1
jax: 0.10.0
libtpu: 0.0.40
codegen_flags: <defaults>
</compile_context>

<pallas_src>
import functools

import jax
import jax.numpy as jnp
from jax.experimental import pallas as pl
from jax.experimental.pallas import tpu as pltpu


_COL_CHOICES = (512, 256, 128)          # lane-dense widths (multiples of 128)
_TARGET_TILE_BYTES = 4 * 1024 * 1024    # ~4 MiB per operand per grid step
_SUBLANE_ALIGN = 32                     # safe sublane alignment for all dtypes
_VMEM_LIMIT = 32 * 1024 * 1024          # double-buffered footprint <= ~16 MiB


def _round_up(x, m):
    return ((x + m - 1) // m) * m


def _sqerr_partial_kernel(x_ref, y_ref, out_ref, *, valid_rows, tile_rows, ragged):
    """Per-tile partial sum of (x - y)^2 over the sublane (row) axis."""
    x = x_ref[...].astype(jnp.float32)
    y = y_ref[...].astype(jnp.float32)
    d = x - y
    sq = d * d
    if ragged:
        # The last grid step's block extends past the end of the (rows, cols)
        # array; Pallas delivers unspecified data there, so zero it out.
        row0 = pl.program_id(0) * tile_rows
        row_ids = row0 + jax.lax.broadcasted_iota(jnp.int32, sq.shape, 0)
        sq = jnp.where(row_ids < valid_rows, sq, 0.0)
    # Small cross-sublane reduce + 1-sublane store are hidden under the DMA.
    out_ref[...] = jnp.sum(sq, axis=0, keepdims=True)[None]   # (1, 1, cols)


def _mse_plain(outputs, targets, reduction):
    d = outputs.astype(jnp.float32) - targets.astype(jnp.float32)
    total = jnp.sum(d * d)
    if reduction == "sum":
        return total.astype(outputs.dtype)
    return (total / outputs.size).astype(outputs.dtype)


@functools.partial(jax.jit, static_argnames=("reduction",))
def l2_loss(outputs, targets, reduction="mean"):
    """JAX/Pallas equivalent of L2Loss.forward: F.mse_loss(outputs, targets)."""
    if outputs.shape != targets.shape:
        raise ValueError("outputs and targets must have the same shape")
    if reduction == "none":
        # TODO(synk): 'none' is a pure elementwise map (no reduction kernel
        # applies); left as plain JAX.
        return (outputs - targets) ** 2
    if reduction not in ("mean", "sum"):
        raise ValueError(f"unsupported reduction: {reduction}")

    n = outputs.size

    # Pick the widest lane-dense column count that divides n exactly so the
    # 2D view is a free reshape (no pad / slice copies of the operands).
    cols = None
    for c in _COL_CHOICES:
        if n % c == 0 and n // c >= 8:
            cols = c
            break
    if cols is None:
        # Tiny or non-128-aligned element count: a fused XLA reduce already
        # reads the minimal 2*n bytes; a pallas_call would only add copies.
        # TODO(synk): in-kernel element mask for non-128-aligned n.
        return _mse_plain(outputs, targets, reduction)

    rows = n // cols
    x2 = outputs.reshape(rows, cols)   # free reshape of contiguous data
    y2 = targets.reshape(rows, cols)

    itemsize = outputs.dtype.itemsize
    # ~4 MiB per operand per step regardless of dtype (bf16 -> 2x the rows).
    target_rows = max(_SUBLANE_ALIGN, _TARGET_TILE_BYTES // (cols * itemsize))

    if rows >= 2 * _SUBLANE_ALIGN:
        # Expose >=2 balanced "parallel" tiles so both v7x TensorCores work.
        num_tiles = max(2, pl.cdiv(rows, target_rows))
        tile_rows = _round_up(pl.cdiv(rows, num_tiles), _SUBLANE_ALIGN)
        num_tiles = pl.cdiv(rows, tile_rows)
    else:
        tile_rows, num_tiles = rows, 1          # block == full dim (legal)
    ragged = (rows % tile_rows) != 0

    kernel = functools.partial(
        _sqerr_partial_kernel,
        valid_rows=rows, tile_rows=tile_rows, ragged=ragged)

    partials = pl.pallas_call(
        kernel,
        grid=(num_tiles,),
        in_specs=[
            pl.BlockSpec((tile_rows, cols), lambda i: (i, 0)),
            pl.BlockSpec((tile_rows, cols), lambda i: (i, 0)),
        ],
        out_specs=pl.BlockSpec((1, 1, cols), lambda i: (i, 0, 0)),
        out_shape=jax.ShapeDtypeStruct((num_tiles, 1, cols), jnp.float32),
        compiler_params=pltpu.CompilerParams(
            dimension_semantics=("parallel",),
            vmem_limit_bytes=_VMEM_LIMIT,
        ),
        cost_estimate=pl.CostEstimate(
            flops=3 * n,
            transcendentals=0,
            bytes_accessed=2 * n * itemsize + num_tiles * cols * 4,
        ),
    )(x2, y2)

    total = jnp.sum(partials)                   # tiny cross-tile/lane glue
    if reduction == "sum":
        return total.astype(outputs.dtype)
    return (total / n).astype(outputs.dtype)


if __name__ == "__main__":
    key = jax.random.PRNGKey(0)
    k0, k1, k2, k3, k4, k5 = jax.random.split(key, 6)

    # Small shape typical of the module's use: (N=2, C=4, 16, 16).
    x = jax.random.normal(k0, (2, 4, 16, 16), jnp.float32)
    y = jax.random.normal(k1, (2, 4, 16, 16), jnp.float32)
    loss = jax.block_until_ready(l2_loss(x, y))
    ref = jnp.mean((x - y) ** 2)
    assert jnp.isfinite(loss), "kernel produced non-finite loss"
    assert jnp.allclose(loss, ref, rtol=1e-5, atol=1e-6), (loss, ref)

    # Larger shape: two parallel tiles; 'sum' and 'mean'.
    a = jax.random.normal(k2, (4, 16, 64, 72), jnp.float32)
    b = jax.random.normal(k3, (4, 16, 64, 72), jnp.float32)
    loss_sum = jax.block_until_ready(l2_loss(a, b, reduction="sum"))
    ref_sum = jnp.sum((a - b) ** 2)
    assert jnp.allclose(loss_sum, ref_sum, rtol=1e-4), (loss_sum, ref_sum)
    loss_mean = jax.block_until_ready(l2_loss(a, b))
    ref_mean = jnp.mean((a - b) ** 2)
    assert jnp.allclose(loss_mean, ref_mean, rtol=1e-4), (loss_mean, ref_mean)

    # Ragged row count: exercises the in-kernel tail mask (no jnp.pad copies).
    c = jax.random.normal(k4, (999, 128), jnp.float32)
    d = jax.random.normal(k5, (999, 128), jnp.float32)
    loss_rag = jax.block_until_ready(l2_loss(c, d))
    ref_rag = jnp.mean((c - d) ** 2)
    assert jnp.allclose(loss_rag, ref_rag, rtol=1e-4), (loss_rag, ref_rag)

    # bf16 inputs stream natively and return a bf16 scalar (PyTorch parity).
    xb, yb = x.astype(jnp.bfloat16), y.astype(jnp.bfloat16)
    loss_bf = jax.block_until_ready(l2_loss(xb, yb))
    ref_bf = jnp.mean((xb.astype(jnp.float32) - yb.astype(jnp.float32)) ** 2)
    assert loss_bf.dtype == jnp.bfloat16
    assert jnp.allclose(loss_bf.astype(jnp.float32), ref_bf, rtol=2e-2), (loss_bf, ref_bf)

    print("KERNEL_OK")
</pallas_src>

<mosaic_0001>
module attributes {stable_mosaic.version = 11 : i64} {
  func.func @_sqerr_partial_kernel(%arg0: i32, %arg1: memref<8x256xf32, #tpu.memory_space<vmem>>, %arg2: memref<8x256xf32, #tpu.memory_space<vmem>>, %arg3: memref<1x1x256xf32, #tpu.memory_space<vmem>>) attributes {dimension_semantics = [#tpu.dimension_semantics<parallel>], iteration_bounds = array<i64: 1>, scalar_prefetch = 0 : i64, scratch_operands = 0 : i64, tpu.core_type = #tpu.core_type<tc>, window_params = [{transform_indices = @transform_0, window_bounds = array<i64: 8, 256>}, {transform_indices = @transform_1, window_bounds = array<i64: 8, 256>}, {transform_indices = @transform_2, window_bounds = array<i64: 1, 1, 256>}]} {
    %c0 = arith.constant 0 : index
    %c0_0 = arith.constant 0 : index
    %0 = vector.load %arg1[%c0, %c0_0] : memref<8x256xf32, #tpu.memory_space<vmem>>, vector<8x256xf32>
    %c0_1 = arith.constant 0 : index
    %c0_2 = arith.constant 0 : index
    %1 = vector.load %arg2[%c0_1, %c0_2] : memref<8x256xf32, #tpu.memory_space<vmem>>, vector<8x256xf32>
    %2 = arith.subf %0, %1 : vector<8x256xf32>
    %3 = arith.mulf %2, %2 : vector<8x256xf32>
    %cst = arith.constant dense<0.000000e+00> : vector<256xf32>
    %4 = vector.multi_reduction <add>, %3, %cst [0] : vector<8x256xf32> to vector<256xf32>
    %5 = vector.shape_cast %4 : vector<256xf32> to vector<1x256xf32>
    %6 = vector.shape_cast %5 : vector<1x256xf32> to vector<1x1x256xf32>
    %c0_3 = arith.constant 0 : index
    %c0_4 = arith.constant 0 : index
    %c0_5 = arith.constant 0 : index
    %7 = vector.load %arg3[%c0_3, %c0_4, %c0_5] : memref<1x1x256xf32, #tpu.memory_space<vmem>>, vector<1x1x256xf32>
    tpu.vector_store %arg3[%c0_3, %c0_4, %c0_5], %6 {strides = array<i32>} : memref<1x1x256xf32, #tpu.memory_space<vmem>>, vector<1x1x256xf32>,
    return
  }
  func.func @transform_0(%arg0: i32) -> (i32, i32) {
    %c0_i32 = arith.constant 0 : i32
    %c0_i32_0 = arith.constant 0 : i32
    return %arg0, %c0_i32 : i32, i32
  }
  func.func @transform_1(%arg0: i32) -> (i32, i32) {
    %c0_i32 = arith.constant 0 : i32
    %c0_i32_0 = arith.constant 0 : i32
    return %arg0, %c0_i32 : i32, i32
  }
  func.func @transform_2(%arg0: i32) -> (i32, i32, i32) {
    %c0_i32 = arith.constant 0 : i32
    %c0_i32_0 = arith.constant 0 : i32
    %c0_i32_1 = arith.constant 0 : i32
    return %arg0, %c0_i32, %c0_i32_0 : i32, i32, i32
  }
}

</mosaic_0001>

<bundles_post_ra>
// kernel: l2_loss.1
= control target key start
LH: loop header
LB: loop body
LE: loop exit
PB: predicated region body
PF: predicated region fallthrough
CT: control target
= control target key end

     0   :  { %v59_v12 = vmov 1966171168   ;;  %v37_v14 = vlaneseq  ;;  %s90_s0 = inlined_call_operand.vmem [shape: f32[8,256], index: 0, kind: input, shape index: {}]   ;;  %s91_s1 = inlined_call_operand.vmem [shape: f32[8,256], index: 1, kind: input, shape index: {}]   ;;  %s92_s2 = inlined_call_operand.vmem [shape: f32[1,1,256], index: 2, kind: output, shape index: {}]  }
   0x1   :  { %v11_v0 = vld [vmem:[%s90_s0] sm:$0xff]  ;;  %v12_v1 = vld [vmem:[%s90_s0 + $0x8] sm:$0xff]  ;;  %v35_v13 = vunpack.c.l.s4 %v59_v12 }
   0x2   :  { %v13_v2 = vld [vmem:[%s91_s1] sm:$0xff]  ;;  %v14_v3 = vld [vmem:[%s91_s1 + $0x8] sm:$0xff]  ;;  %v38_v20 = vshrl.u32 %v37_v14, 7  ;;  %vm51_vm0 = vcmp.lt.s32.totalorder %v37_v14, 256 }
   0x3   :  { %v15_v4 = vsub.f32 %v11_v0, %v13_v2  ;;  %v16_v5 = vsub.f32 %v12_v1, %v14_v3  ;;  %v36_v19 = vunpack.c.0.s8 %v35_v13 }
   0x5   :  { %v17_v6 = vmul.f32 %v15_v4, %v15_v4  ;;  %v18_v7 = vmul.f32 %v16_v5, %v16_v5  ;;  %v39_v25 = vsub.s32 %v36_v19, %v38_v20 }
   0x7   :  { %v19_v8 = vrot.slane %v17_v6, 4  ;;  %v25_v9 = vrot.slane %v18_v7, 4 }
   0x9   :  { %v20_v10 = vadd.f32 %v19_v8, %v17_v6  ;;  %v26_v11 = vadd.f32 %v25_v9, %v18_v7 }
   0xb   :  { %v21_v15 = vrot.slane %v20_v10, 2  ;;  %v27_v16 = vrot.slane %v26_v11, 2 }
   0xd   :  { %v22_v17 = vadd.f32 %v21_v15, %v20_v10  ;;  %v28_v18 = vadd.f32 %v27_v16, %v26_v11 }
   0xf   :  { %v23_v21 = vrot.slane %v22_v17, 1  ;;  %v29_v22 = vrot.slane %v28_v18, 1 }
  0x11   :  { %v24_v23 = vadd.f32 %v23_v21, %v22_v17  ;;  %v30_v24 = vadd.f32 %v29_v22, %v28_v18 }
  0x13   :  { %v33_v26 = vcombine.low %v24_v23, %v30_v24 }
  0x15   :  { %v40_v27 = vrot.slane %v33_v26, %v39_v25 }
  0x17   :  { %v47_v28 = vrot.slane %v40_v27, %v39_v25 }
  0x19   :  { %53 = vst.msk [vmem:[%s92_s2] sm:$0x3] %vm51_vm0, %v47_v28 }

</bundles_post_ra>
